<compile_context>
chip_gen: v7x
topology: tpu7x:2x2x1
jax: 0.10.0
libtpu: 0.0.40
codegen_flags: <defaults>
</compile_context>

<pallas_src>
import functools
import math

import jax
import jax.numpy as jnp
from jax import lax
from jax.experimental import pallas as pl
from jax.experimental.pallas import tpu as pltpu


# Target rows (= flattened (i, j) positions) per grid step.
#
# VMEM accounting (lane-padded!): a (rows, D=32) f32 block is padded to 128
# lanes in VMEM, i.e. rows * 128 * 4 B = 512 B/row.  At 4096 rows: x block
# 2 MiB + y block 2 MiB (each double-buffered by the pipeline) + the small
# (H, rows) logits block + a handful of 2 MiB f32 temporaries inside the
# kernel -> ~16-20 MiB peak, under the 40 MiB scoped limit below (v5e/v6e have
# 128 MiB physical VMEM, v7x 64 MiB).  Per-step HBM traffic at 4096 rows is
# ~1 MiB, amortizing the ~0.35 us fixed per-step pipeline overhead on v5e/v6e;
# on v7x (3.2 TB/s) this could be raised to 8192-16384 rows with a matching
# vmem_limit_bytes bump.
_MAX_TILE_ROWS = 4096
_VMEM_LIMIT_BYTES = 40 * 1024 * 1024

_COMPILER_PARAMS = pltpu.CompilerParams(
    dimension_semantics=("parallel", "parallel"),   # both grid axes independent
    vmem_limit_bytes=_VMEM_LIMIT_BYTES,
)


# ---------------------------------------------------------------------------
# Kernel 1: fused LayerNorm(D) + Linear(D -> H, no bias), natural row layout.
# ---------------------------------------------------------------------------
def _ln_linear_rows_kernel(x_ref, g_ref, b_ref, w_ref, y_ref, lt_ref, *, eps):
    # x_ref: (tile, D) in native dtype.  Tail blocks (rows beyond R) contain
    # garbage rows; that is safe because all output stores are masked and each
    # logits column depends only on its own row.
    x = x_ref[...].astype(jnp.float32)
    mean = jnp.mean(x, axis=-1, keepdims=True)
    cen = x - mean
    var = jnp.mean(cen * cen, axis=-1, keepdims=True)          # biased var (torch LN)
    y = cen * lax.rsqrt(var + eps) * g_ref[...] + b_ref[...]   # (tile, D) f32
    yc = y.astype(y_ref.dtype)
    # NOTE: D=32 < 128 lanes -> this store is a masked vst; unavoidable given
    # the (..., D) output layout required downstream.
    y_ref[...] = yc
    # logits[h, m] = sum_d w[h, d] * y[m, d]; contraction via dimension_numbers
    # (A . B^T) so no materialized y.T relayout feeds the MXU.
    lt = lax.dot_general(
        w_ref[...], yc.astype(w_ref.dtype),
        dimension_numbers=(((1,), (1,)), ((), ())),
        preferred_element_type=jnp.float32)
    lt_ref[...] = lt.astype(lt_ref.dtype)                      # (H, tile), lane-dense


def _call_rows(x, gamma, beta, w_hd, *, eps, tile):
    """x: (B, R, D) -> (y (B,R,D), logits_t (B,H,R))."""
    B, R, D = x.shape
    H = w_hd.shape[0]
    grid = (B, pl.cdiv(R, tile))
    return pl.pallas_call(
        functools.partial(_ln_linear_rows_kernel, eps=eps),
        out_shape=(jax.ShapeDtypeStruct((B, R, D), x.dtype),
                   jax.ShapeDtypeStruct((B, H, R), x.dtype)),
        grid_spec=pltpu.PrefetchScalarGridSpec(
            num_scalar_prefetch=0,
            grid=grid,
            in_specs=[
                pl.BlockSpec((None, tile, D), lambda b, i: (b, i, 0)),
                pl.BlockSpec((1, D), lambda b, i: (0, 0)),
                pl.BlockSpec((1, D), lambda b, i: (0, 0)),
                pl.BlockSpec((H, D), lambda b, i: (0, 0)),
            ],
            out_specs=[
                pl.BlockSpec((None, tile, D), lambda b, i: (b, i, 0)),
                pl.BlockSpec((None, H, tile), lambda b, i: (b, 0, i)),
            ],
        ),
        compiler_params=_COMPILER_PARAMS,
    )(x, gamma, beta, w_hd)


# ---------------------------------------------------------------------------
# Kernel 2: same math, but the (S1, S2) swap of the LayerNorm output is folded
# into the output DMA (for starting=False) -> no extra HBM pass over hidden.
# ---------------------------------------------------------------------------
def _ln_linear_swap_kernel(x_ref, g_ref, b_ref, w_ref, y_ref, lt_ref, *, eps):
    # x_ref: (ti, S2, D);  y_ref: (S2, ti, D) transposed block;  lt_ref: (H, ti*S2)
    x = x_ref[...].astype(jnp.float32)
    mean = jnp.mean(x, axis=-1, keepdims=True)
    cen = x - mean
    var = jnp.mean(cen * cen, axis=-1, keepdims=True)
    y = cen * lax.rsqrt(var + eps) * g_ref[...] + b_ref[...]   # (ti, S2, D) f32
    yc = y.astype(y_ref.dtype)
    # Within-block major-dim swap on-chip (copy/XLU slots are idle in this
    # HBM-bound kernel); block indices are swapped in the out BlockSpec.
    y_ref[...] = pltpu.einshape("isd->sid", yc)                # (S2, ti, D)
    ti, s2, d = yc.shape
    y2 = yc.reshape(ti * s2, d)                                # collapse leading dims
    lt = lax.dot_general(
        w_ref[...], y2.astype(w_ref.dtype),
        dimension_numbers=(((1,), (1,)), ((), ())),
        preferred_element_type=jnp.float32)
    lt_ref[...] = lt.astype(lt_ref.dtype)                      # natural (i-major) order


def _call_swap(x, gamma, beta, w_hd, *, eps, ti):
    """x: (B, S1, S2, D) -> (y (B,S2,S1,D) already swapped, logits_t (B,H,S1*S2))."""
    B, S1, S2, D = x.shape
    H = w_hd.shape[0]
    R = S1 * S2
    grid = (B, pl.cdiv(S1, ti))
    return pl.pallas_call(
        functools.partial(_ln_linear_swap_kernel, eps=eps),
        out_shape=(jax.ShapeDtypeStruct((B, S2, S1, D), x.dtype),
                   jax.ShapeDtypeStruct((B, H, R), x.dtype)),
        grid_spec=pltpu.PrefetchScalarGridSpec(
            num_scalar_prefetch=0,
            grid=grid,
            in_specs=[
                pl.BlockSpec((None, ti, S2, D), lambda b, i: (b, i, 0, 0)),
                pl.BlockSpec((1, D), lambda b, i: (0, 0)),
                pl.BlockSpec((1, D), lambda b, i: (0, 0)),
                pl.BlockSpec((H, D), lambda b, i: (0, 0)),
            ],
            out_specs=[
                pl.BlockSpec((None, S2, ti, D), lambda b, i: (b, 0, i, 0)),
                pl.BlockSpec((None, H, ti * S2), lambda b, i: (b, 0, i)),
            ],
        ),
        compiler_params=_COMPILER_PARAMS,
    )(x, gamma, beta, w_hd)


def _choose_ti(S1, S2, max_rows):
    # Granularity so that the transposed y block (.., ti, D) and the flat
    # logits block (H, ti*S2) both satisfy the (8, 128) tiling rule:
    #   ti % 8 == 0  and  (ti * S2) % 128 == 0   (unless ti == S1, full dim).
    gran = max(8, 128 // math.gcd(S2, 128))
    if S1 * S2 <= max_rows:
        return S1
    ti = max(gran, (max_rows // S2) // gran * gran)
    return S1 if ti >= S1 else ti


# ---------------------------------------------------------------------------
# Wrapper reproducing TCRGenTriangularAttention.forward (as provided).
# ---------------------------------------------------------------------------
def tcrgen_triangular_attention_forward(
    hidden_states, params, attention_mask=None, *, starting=True,
    neg_inf=-1e9, eps=1e-5,
):
    B, S1, S2, D = hidden_states.shape
    H = params["linear_w"].shape[0]            # torch Linear weight layout: [H, D]
    R = S1 * S2

    gamma = params["ln_gamma"].reshape(1, D).astype(jnp.float32)
    beta = params["ln_beta"].reshape(1, D).astype(jnp.float32)
    # bf16 activations -> bf16 MXU operands (f32 accumulate); f32 otherwise.
    w_dt = hidden_states.dtype if hidden_states.dtype == jnp.bfloat16 else jnp.float32
    w_hd = params["linear_w"].astype(w_dt)

    if starting:
        tile = R if R <= _MAX_TILE_ROWS else _MAX_TILE_ROWS
        if B == 1 and tile == R and R >= 256:
            # single batch: split into >=2 blocks so both v7x TensorCores get work
            tile = min(_MAX_TILE_ROWS, ((R + 1) // 2 + 127) // 128 * 128)
        x = hidden_states.reshape(B, R, D)     # free metadata reshape, no upcast
        y, lt = _call_rows(x, gamma, beta, w_hd, eps=eps, tile=tile)
        ln_hidden = y.reshape(B, S1, S2, D)
        triangular_bias = lt.reshape(B, H, S1, S2)[:, None]      # (B,1,H,S1,S2)
        if attention_mask is None:
            # default mask is all-ones -> bias identically zero: no HBM pass.
            mask_bias = jnp.zeros((B, S1, 1, 1, S2), jnp.float32)
        else:
            m = attention_mask.astype(jnp.float32)
            mask_bias = (neg_inf * (1.0 - m))[..., :, None, None, :]
        return mask_bias, triangular_bias, ln_hidden

    # ------------------------- starting = False ---------------------------
    ti = _choose_ti(S1, S2, _MAX_TILE_ROWS)
    rows = (S1 if ti >= S1 else ti) * S2
    if rows <= 2 * _MAX_TILE_ROWS:
        # Fused path: the (S1, S2) swap of the LN output is folded into the
        # kernel's output DMA, so the dominant tensor is written exactly once.
        y, lt = _call_swap(hidden_states, gamma, beta, w_hd, eps=eps, ti=ti)
        ln_hidden = y                                            # (B, S2, S1, D)
    else:
        # TODO(synk): pathological tile granularity (large S2 nearly coprime
        # with 128): fall back to the natural-layout kernel + XLA transpose.
        tile = R if R <= _MAX_TILE_ROWS else _MAX_TILE_ROWS
        x = hidden_states.reshape(B, R, D)
        y, lt = _call_rows(x, gamma, beta, w_hd, eps=eps, tile=tile)
        ln_hidden = jnp.swapaxes(y.reshape(B, S1, S2, D), -2, -3)

    # The triangular-bias swap stays in the wrapper: logits are D/H (=8x here)
    # smaller than hidden, so this pass is cheap and it keeps the in-kernel
    # logits store lane-dense.
    triangular_bias = jnp.swapaxes(
        lt.reshape(B, H, S1, S2), -1, -2)[:, None]               # (B,1,H,S2,S1)
    if attention_mask is None:
        mask_bias = jnp.zeros((B, S2, 1, 1, S1), jnp.float32)
    else:
        m = jnp.swapaxes(attention_mask, -1, -2).astype(jnp.float32)
        mask_bias = (neg_inf * (1.0 - m))[..., :, None, None, :]
    return mask_bias, triangular_bias, ln_hidden


if __name__ == "__main__":
    # config: hidden_dim=32, num_attention_heads=4, neg_inf=-1e9, ln eps=1e-5
    B, S, D, H = 2, 8, 32, 4
    key = jax.random.PRNGKey(0)
    k1, k2, k3 = jax.random.split(key, 3)

    hidden = jax.random.normal(k1, (B, S, S, D), jnp.float32)
    attn_mask = (jax.random.uniform(k2, (B, S, S)) > 0.2).astype(jnp.float32)

    params = {
        "ln_gamma": jnp.ones((D,), jnp.float32),     # nn.LayerNorm default init
        "ln_beta": jnp.zeros((D,), jnp.float32),
        "linear_w": 0.02 * jax.random.normal(k3, (H, D), jnp.float32),
    }

    # plain-JAX reference for correctness checks
    def ref(hidden, params, mask, *, starting, neg_inf=-1e9, eps=1e-5):
        if mask is None:
            mask = jnp.ones(hidden.shape[:-1], hidden.dtype)
        if not starting:
            hidden = jnp.swapaxes(hidden, -2, -3)
            mask = jnp.swapaxes(mask, -1, -2)
        mu = jnp.mean(hidden, -1, keepdims=True)
        var = jnp.mean((hidden - mu) ** 2, -1, keepdims=True)
        xn = (hidden - mu) / jnp.sqrt(var + eps) * params["ln_gamma"] + params["ln_beta"]
        mb = (neg_inf * (1.0 - mask))[..., :, None, None, :]
        tb = jnp.einsum("bijd,hd->bijh", xn, params["linear_w"])
        tb = jnp.transpose(tb, (0, 3, 1, 2))[:, None]
        return mb, tb, xn

    for starting in (True, False):
        fwd = jax.jit(functools.partial(
            tcrgen_triangular_attention_forward, starting=starting))
        mask_bias, tri_bias, ln_hidden = fwd(hidden, params, attn_mask)
        jax.block_until_ready((mask_bias, tri_bias, ln_hidden))

        mb_ref, tb_ref, ln_ref = ref(hidden, params, attn_mask, starting=starting)
        assert mask_bias.shape == mb_ref.shape
        assert tri_bias.shape == tb_ref.shape
        assert ln_hidden.shape == ln_ref.shape
        assert jnp.allclose(mask_bias, mb_ref, atol=1e-4, rtol=1e-4)
        assert jnp.allclose(ln_hidden, ln_ref, atol=1e-4, rtol=1e-4)
        assert jnp.allclose(tri_bias, tb_ref, atol=1e-4, rtol=1e-4)

    # default-mask path: bias must be identically zero with no extra HBM pass
    mb0, tb0, ln0 = jax.jit(tcrgen_triangular_attention_forward)(hidden, params, None)
    jax.block_until_ready((mb0, tb0, ln0))
    assert jnp.allclose(mb0, 0.0)
    mb0_ref, tb0_ref, _ = ref(hidden, params, None, starting=True)
    assert jnp.allclose(tb0, tb0_ref, atol=1e-4, rtol=1e-4)

    print("KERNEL_OK")
</pallas_src>

<mosaic_0001>
module attributes {stable_mosaic.version = 11 : i64} {
  func.func @_ln_linear_rows_kernel(%arg0: i32, %arg1: i32, %arg2: memref<1x64x32xf32, #tpu.memory_space<vmem>>, %arg3: memref<1x32xf32, #tpu.memory_space<vmem>>, %arg4: memref<1x32xf32, #tpu.memory_space<vmem>>, %arg5: memref<4x32xf32, #tpu.memory_space<vmem>>, %arg6: memref<1x64x32xf32, #tpu.memory_space<vmem>>, %arg7: memref<1x4x64xf32, #tpu.memory_space<vmem>>) attributes {dimension_semantics = [#tpu.dimension_semantics<parallel>, #tpu.dimension_semantics<parallel>], iteration_bounds = array<i64: 2, 1>, scalar_prefetch = 0 : i64, scratch_operands = 0 : i64, tpu.core_type = #tpu.core_type<tc>, window_params = [{transform_indices = @transform_0, window_bounds = array<i64: 1, 64, 32>}, {pipeline_mode = #tpu.pipeline_mode<synchronous>, transform_indices = @transform_1, window_bounds = array<i64: 1, 32>}, {pipeline_mode = #tpu.pipeline_mode<synchronous>, transform_indices = @transform_2, window_bounds = array<i64: 1, 32>}, {pipeline_mode = #tpu.pipeline_mode<synchronous>, transform_indices = @transform_3, window_bounds = array<i64: 4, 32>}, {transform_indices = @transform_4, window_bounds = array<i64: 1, 64, 32>}, {transform_indices = @transform_5, window_bounds = array<i64: 1, 4, 64>}]} {
    %c0 = arith.constant 0 : index
    %c0_0 = arith.constant 0 : index
    %c0_1 = arith.constant 0 : index
    %0 = vector.load %arg2[%c0, %c0_0, %c0_1] : memref<1x64x32xf32, #tpu.memory_space<vmem>>, vector<1x64x32xf32>
    %1 = vector.shape_cast %0 : vector<1x64x32xf32> to vector<64x32xf32>
    %cst = arith.constant dense<0.000000e+00> : vector<64xf32>
    %2 = vector.multi_reduction <add>, %1, %cst [1] : vector<64x32xf32> to vector<64xf32>
    %3 = vector.shape_cast %2 : vector<64xf32> to vector<64x1xf32>
    %cst_2 = arith.constant 3.200000e+01 : f32
    %4 = vector.broadcast %cst_2 : f32 to vector<64x1xf32>
    %5 = arith.divf %3, %4 : vector<64x1xf32>
    %6 = vector.broadcast %5 : vector<64x1xf32> to vector<64x32xf32>
    %7 = arith.subf %1, %6 : vector<64x32xf32>
    %8 = arith.mulf %7, %7 : vector<64x32xf32>
    %cst_3 = arith.constant dense<0.000000e+00> : vector<64xf32>
    %9 = vector.multi_reduction <add>, %8, %cst_3 [1] : vector<64x32xf32> to vector<64xf32>
    %10 = vector.shape_cast %9 : vector<64xf32> to vector<64x1xf32>
    %cst_4 = arith.constant 3.200000e+01 : f32
    %11 = vector.broadcast %cst_4 : f32 to vector<64x1xf32>
    %12 = arith.divf %10, %11 : vector<64x1xf32>
    %cst_5 = arith.constant 9.99999974E-6 : f32
    %13 = vector.broadcast %cst_5 : f32 to vector<64x1xf32>
    %14 = arith.addf %12, %13 : vector<64x1xf32>
    %15 = math.rsqrt %14 : vector<64x1xf32>
    %16 = vector.broadcast %15 : vector<64x1xf32> to vector<64x32xf32>
    %17 = arith.mulf %7, %16 : vector<64x32xf32>
    %c0_6 = arith.constant 0 : index
    %c0_7 = arith.constant 0 : index
    %18 = vector.load %arg3[%c0_6, %c0_7] : memref<1x32xf32, #tpu.memory_space<vmem>>, vector<1x32xf32>
    %19 = vector.broadcast %18 : vector<1x32xf32> to vector<64x32xf32>
    %20 = arith.mulf %17, %19 : vector<64x32xf32>
    %c0_8 = arith.constant 0 : index
    %c0_9 = arith.constant 0 : index
    %21 = vector.load %arg4[%c0_8, %c0_9] : memref<1x32xf32, #tpu.memory_space<vmem>>, vector<1x32xf32>
    %22 = vector.broadcast %21 : vector<1x32xf32> to vector<64x32xf32>
    %23 = arith.addf %20, %22 : vector<64x32xf32>
    %c0_10 = arith.constant 0 : index
    %c0_11 = arith.constant 0 : index
    %c0_12 = arith.constant 0 : index
    %24 = vector.load %arg6[%c0_10, %c0_11, %c0_12] : memref<1x64x32xf32, #tpu.memory_space<vmem>>, vector<1x64x32xf32>
    %25 = vector.shape_cast %24 : vector<1x64x32xf32> to vector<64x32xf32>
    %26 = vector.shape_cast %23 : vector<64x32xf32> to vector<1x64x32xf32>
    tpu.vector_store %arg6[%c0_10, %c0_11, %c0_12], %26 {strides = array<i32>} : memref<1x64x32xf32, #tpu.memory_space<vmem>>, vector<1x64x32xf32>,
    %c0_13 = arith.constant 0 : index
    %c0_14 = arith.constant 0 : index
    %27 = vector.load %arg5[%c0_13, %c0_14] : memref<4x32xf32, #tpu.memory_space<vmem>>, vector<4x32xf32>
    %cst_15 = arith.constant dense<0.000000e+00> : vector<4x64xf32>
    %28 = tpu.matmul %27, %23, %cst_15 {dimension_numbers = #tpu.dot_dimension_numbers<[1], [1], [0], [0], [0, 0, 1, 0], [], []>} : vector<4x32xf32>, vector<64x32xf32>, vector<4x64xf32> -> vector<4x64xf32>
    %c0_16 = arith.constant 0 : index
    %c0_17 = arith.constant 0 : index
    %c0_18 = arith.constant 0 : index
    %29 = vector.load %arg7[%c0_16, %c0_17, %c0_18] : memref<1x4x64xf32, #tpu.memory_space<vmem>>, vector<1x4x64xf32>
    %30 = vector.shape_cast %29 : vector<1x4x64xf32> to vector<4x64xf32>
    %31 = vector.shape_cast %28 : vector<4x64xf32> to vector<1x4x64xf32>
    tpu.vector_store %arg7[%c0_16, %c0_17, %c0_18], %31 {strides = array<i32>} : memref<1x4x64xf32, #tpu.memory_space<vmem>>, vector<1x4x64xf32>,
    return
  }
  func.func @transform_0(%arg0: i32, %arg1: i32) -> (i32, i32, i32) {
    %c0_i32 = arith.constant 0 : i32
    %c0_i32_0 = arith.constant 0 : i32
    return %arg0, %arg1, %c0_i32 : i32, i32, i32
  }
  func.func @transform_1(%arg0: i32, %arg1: i32) -> (i32, i32) {
    %c0_i32 = arith.constant 0 : i32
    %c0_i32_0 = arith.constant 0 : i32
    %c0_i32_1 = arith.constant 0 : i32
    return %c0_i32, %c0_i32_0 : i32, i32
  }
  func.func @transform_2(%arg0: i32, %arg1: i32) -> (i32, i32) {
    %c0_i32 = arith.constant 0 : i32
    %c0_i32_0 = arith.constant 0 : i32
    %c0_i32_1 = arith.constant 0 : i32
    return %c0_i32, %c0_i32_0 : i32, i32
  }
  func.func @transform_3(%arg0: i32, %arg1: i32) -> (i32, i32) {
    %c0_i32 = arith.constant 0 : i32
    %c0_i32_0 = arith.constant 0 : i32
    %c0_i32_1 = arith.constant 0 : i32
    return %c0_i32, %c0_i32_0 : i32, i32
  }
  func.func @transform_4(%arg0: i32, %arg1: i32) -> (i32, i32, i32) {
    %c0_i32 = arith.constant 0 : i32
    %c0_i32_0 = arith.constant 0 : i32
    return %arg0, %arg1, %c0_i32 : i32, i32, i32
  }
  func.func @transform_5(%arg0: i32, %arg1: i32) -> (i32, i32, i32) {
    %c0_i32 = arith.constant 0 : i32
    %c0_i32_0 = arith.constant 0 : i32
    return %arg0, %c0_i32, %arg1 : i32, i32, i32
  }
}

</mosaic_0001>

<bundles_post_ra>
// kernel: tcrgen_triangular_attention_forward.1
= control target key start
LH: loop header
LB: loop body
LE: loop exit
PB: predicated region body
PF: predicated region fallthrough
CT: control target
= control target key end

     0   :  { %11 = vsyncpa [#allocation3], 0  ;;  %s1276_s0 = inlined_call_operand.hbm [shape: f32[2,64,32], index: 0, kind: input, shape index: {}]   ;;  %s1277_s1 = inlined_call_operand.vmem [shape: f32[1,32], index: 1, kind: input, shape index: {}]   ;;  %s1278_s2 = inlined_call_operand.vmem [shape: f32[1,32], index: 2, kind: input, shape index: {}]   ;;  %s1279_s3 = inlined_call_operand.vmem [shape: f32[4,32], index: 3, kind: input, shape index: {}]   ;;  %s1280_s4 = inlined_call_operand.hbm [shape: f32[2,64,32], index: 4, kind: output, shape index: {0}]   ;;  %s1281_s5 = inlined_call_operand.vmem [shape: f32[2,4,64], index: 5, kind: output, shape index: {1}]  }
   0x1   :  { %13 = vsyncpa [#allocation3 + $0x1], 0 }
   0x2   :  { %14 = vsyncpa [#allocation4], 0 }
   0x3   :  { %16 = vsyncpa [#allocation4 + $0x1], 0  ;;  %s989_s18 = smov 0   ;;  %s991_s19 = smov 0  }
   0x4   :  { %s993_s20 = smov 0   ;;  %s995_s21 = smov 0  }
   0x5   :  { %s997_s22 = smov 0   ;;  %s999_s23 = smov 0  }
   0x6 LB: > { %s678_s24 = sadd.s32 4294967295, %s948_s23   ;;  %s679_s25 = sadd.s32 4294967294, %s948_s23   ;;  %s948_s23 = sphi %s999_s23, %s22_s23   ;;  %s944_s22 = sphi %s997_s22, %s1298_s22   ;;  %s940_s21 = sphi %s995_s21, %s1297_s21   ;;  %s936_s20 = sphi %s993_s20, %s1296_s20   ;;  %s932_s19 = sphi %s991_s19, %s1295_s19   ;;  %s928_s18 = sphi %s989_s18, %s1294_s18  }
   0x7   : > { %s34_s26 = sadd.s32 1, %s944_s22  ;;  %s43_s27 = sadd.s32 1, %s936_s20 }
   0x8   : > { %p36_p0 = scmp.ge.s32.totalorder %s34_s26, 2  ;;  %p50_p1 = scmp.ne.s32.totalorder %s936_s20, %s932_s19 }
   0x9   : > { %p51_p2 = scmp.eq.s32.totalorder %s948_s23, 0  ;;  %p56_p3 = scmp.ne.s32.totalorder %s932_s19, %s928_s18 }
   0xa   : > { %s1300_s26 = smov (%p36_p0, %s34_s26), 0  ;;  %p57_p5 = scmp.eq.s32.totalorder %s678_s24, 0 }
   0xb   : > { %p1030_p4 = por %p51_p2, %p50_p1  ;;  %s38_s29 = ssub.s32 %s944_s22, %s1300_s26 }
   0xc   : > { %p145_p6 = scmp.eq.s32.totalorder %s678_s24, 1  ;;  %p41_p7 = scmp.eq.s32.totalorder %s38_s29, 0 }
   0xd   : > { %p1036_p8 = por %p57_p5, %p56_p3  ;;  %p151_p10 = scmp.eq.s32.totalorder %s679_s25, 1 }
   0xe   : > { %p1040_p9 = por %p145_p6, %p50_p1  ;;  %p763_p13 = scmp.lt.s32.totalorder %s948_s23, 2 }
   0xf   : > { %s1045_s7 = scalar_select %p41_p7, %s936_s20, %s43_s27  }
  0x10   : > { %s1285_s6 = scalar_select %p1040_p9, 1, 0 }
  0x11   : > { %p1047_p11 = por %p151_p10, %p56_p3  ;;  %s208_s9 = sand.u32 1, %s936_s20  }
  0x12   : > { %s682_s10 = sshll.u32 %s208_s9, 6  ;;  %s705_s11 = sshll.u32 %s944_s22, 10 }
  0x13   : > { %s1286_s8 = scalar_select %p1047_p11, 1, 0 }
  0x14   : > { %s1058_s14 = scalar_lea.hbm %s1276_s0, %s705_s11  ;;  %s212_s15 = scalar_lea.vmem [#allocation2], %s682_s10 }
  0x15   : > { %s221_s16 = sshll.u32 %s212_s15, 4  ;;  %p1064_p0 = pnand %p763_p13, %p1030_p4  ;;  %s1060_s16 = int_to_ptr.vmem [resolvable:$true] %s221_s16 }
  0x16   : > { %s1069_s24 = scalar_lea.sflag [#allocation3], %s208_s9  ;;  %s836_s25 = scalar_lea.hbm %s1058_s14, 1024 }
  0x17   : > { %p837_p2 = scmp.ne.s32.totalorder %s1058_s14, %s836_s25  ;;  %p838_p3 = pneg %p1064_p0 }
  0x18   : > { %s841_s28 = scalar_lea.hbm %s1276_s0, 2048  ;;  %p842_p4 = scmp.lt.u32.totalorder %s1058_s14, %s1276_s0 }
  0x19   : > { %p839_p5 = pnand %p838_p3, %p837_p2  ;;  %p843_p7 = scmp.lt.u32.totalorder %s841_s28, %s836_s25 }
  0x1a   : > { %p845_p13 = scmp.lt.u32.totalorder %s836_s25, %s1058_s14 }
  0x1b   : > { %p840_p6 = pneg %p839_p5  ;;  %p844_p10 = por %p843_p7, %p842_p4 }
  0x1d   : > { %p846_p12 = por %p845_p13, %p844_p10 }
  0x1f   : > { %p847_p1 = pnand %p846_p12, %p840_p6 }
  0x21   : > { %850 = shalt.err (!%p847_p1)
}
  0x22   : > { %s851_s9 = scalar_lea.vmem %s1060_s16, 1024  ;;  %s950_s12 = smov [#allocation2]  }
  0x23   : > { %p852_p2 = scmp.ne.s32.totalorder %s1060_s16, %s851_s9  ;;  %s856_s13 = sshll.u32 %s950_s12, 4  ;;  %s857_s13 = int_to_ptr.vmem [resolvable:$false] %s856_s13 }
  0x24   : > { %s858_s15 = scalar_lea.vmem %s857_s13, 2048  ;;  %p859_p9 = scmp.lt.s32.totalorder %s1060_s16, %s857_s13 }
  0x25   : > { %p854_p5 = pnand %p852_p2, %p838_p3  ;;  %p860_p4 = scmp.lt.s32.totalorder %s858_s15, %s851_s9 }
  0x27   : > { %p855_p11 = pneg %p854_p5  ;;  %p861_p7 = por %p860_p4, %p859_p9 }
  0x29   : > { %p862_p10 = pnand %p861_p7, %p855_p11 }
  0x2b   : > { %865 = shalt.err (!%p862_p10)
}
  0x2c   : > { %s951_s25 = smov 128   ;;  %s952_s27 = smov 8  }
  0x2d   : > { %758 = dma.hbm_to_vmem [thread:$0]  (!%p1064_p0), %s1058_s14, 1024, %s1060_s16, %s1069_s24, %s951_s25, %s951_s25, %s952_s27  }
  0x2e   : > { %p229_p12 = scmp.lt.s32.totalorder %s948_s23, 3  ;;  %p1288_p1 = scmp.ge.s32.totalorder %s948_s23, 1 }
  0x30   : > { %p230_p3 = pnand %p1288_p1, %p229_p12 }
  0x31   : > { %s1101_s29 = sand.u32 (!%p230_p3), 1, %s932_s19  }
  0x32   : > { %233 = sbr.rel (%p230_p3) target bundleno = 622 (0x26e), region = 36  ;;  %s686_s28 = sshll.u32 (!%p230_p3), %s1101_s29, 6 }
  0x33   : > { %s236_s10 = scalar_lea.sflag (!%p230_p3), [#allocation3], %s1101_s29  ;;  %s239_s11 = scalar_lea.vmem (!%p230_p3), [#allocation2], %s686_s28 }
  0x39   : > { %919 = dma.done.wait (%p1036_p8), %s236_s10, 1024  }
  0x3a   : > { %921 = vsyncadd (%p1036_p8), %s236_s10, 4294966272  ;;  %vm290_vm0 = vcmask 261120   ;;  %v282_v0 = vld [vmem:[%s239_s11] sm:$0xff]  ;;  %v284_v1 = vld [vmem:[%s239_s11 + $0x10] sm:$0xff]  ;;  %v953_v56 = vmov 0.0|0.0   ;;  %vm954_vm1 = vmmov 0  }
  0x3b   : > { %v283_v2 = vld [vmem:[%s239_s11 + $0x8] sm:$0xff]  ;;  %v291_v3 = vsel %vm290_vm0, %v282_v0, 0.0  ;;  %v297_v4 = vsel %vm290_vm0, %v284_v1, 0.0  ;;  %v285_v5 = vld [vmem:[%s239_s11 + $0x18] sm:$0xff]  ;;  %v286_v8 = vld [vmem:[%s239_s11 + $0x20] sm:$0xff]  ;;  %735 = vmatprep.subr.bf16.mxu0 %v953_v56  ;;  %v955_v57 = vmov 0.0  }
  0x3c   : > { %292 = vadd.xlane.f32.xlu0 %v291_v3  ;;  %298 = vadd.xlane.f32.xlu1 %v297_v4  ;;  %v294_v6 = vsel %vm290_vm0, %v283_v2, 0.0  ;;  %v300_v7 = vsel %vm290_vm0, %v285_v5, 0.0  ;;  %v287_v9 = vld [vmem:[%s239_s11 + $0x28] sm:$0xff]  ;;  %v303_v10 = vsel %vm290_vm0, %v286_v8, 0.0  ;;  %v288_v12 = vld [vmem:[%s239_s11 + $0x30] sm:$0xff]  ;;  %v289_v13 = vld [vmem:[%s239_s11 + $0x38] sm:$0xff] }
  0x3d   : > { %v306_v11 = vsel %vm290_vm0, %v287_v9, 0.0  ;;  %v309_v14 = vsel %vm290_vm0, %v288_v12, 0.0  ;;  %v312_v15 = vsel %vm290_vm0, %v289_v13, 0.0  ;;  %732 = vmatprep.mubr.msk.f32.mxu0 %vm954_vm1, %v955_v57  ;;  %s1171_s24 = scalar_lea.vmem [#allocation5], %s686_s28  ;;  %vm1179_vm2 = vmpackc.low %vm290_vm0, %vm290_vm0  ;;  %s706_s13 = sshll.u32 %s940_s21, 10 }
  0x3e   : > { %s557_s15 = sshll.u32 %s1171_s24, 4  ;;  %s1220_s28 = scalar_lea.hbm %s1280_s4, %s706_s13  ;;  %s1222_s15 = int_to_ptr.vmem [resolvable:$true] %s557_s15 }
  0x3f   : > { %s535_s10 = scalar_lea.sflag [#allocation4], %s1101_s29  ;;  %s866_s11 = scalar_lea.vmem %s1222_s15, 1024 }
  0x40   : > { %295 = vadd.xlane.f32.xlu0 %v294_v6  ;;  %301 = vadd.xlane.f32.xlu1 %v300_v7  ;;  %p867_p8 = scmp.ne.s32.totalorder %s1222_s15, %s866_s11  ;;  %p1291_p9 = scmp.ne.s32.totalorder %s1285_s6, 0 }
  0x41   : > { %s956_s30 = smov [#allocation5]  }
  0x42   : > { %p868_p11 = pnand %p867_p8, %p1291_p9  ;;  %s870_s14 = sshll.u32 %s956_s30, 4  ;;  %s871_s14 = int_to_ptr.vmem [resolvable:$false] %s870_s14 }
  0x43   : > { %s872_s16 = scalar_lea.vmem %s871_s14, 2048  ;;  %p873_p6 = scmp.lt.s32.totalorder %s1222_s15, %s871_s14 }
  0x44   : > { %304 = vadd.xlane.f32.xlu0 %v303_v10  ;;  %307 = vadd.xlane.f32.xlu1 %v306_v11  ;;  %p869_p0 = pneg %p868_p11  ;;  %p874_p13 = scmp.lt.s32.totalorder %s872_s16, %s866_s11 }
  0x46   : > { %p875_p2 = por %p874_p13, %p873_p6 }
  0x48   : > { %310 = vadd.xlane.f32.xlu0 %v309_v14  ;;  %313 = vadd.xlane.f32.xlu1 %v312_v15  ;;  %p876_p5 = pnand %p875_p2, %p869_p0 }
  0xc9   : > { %v293_v16 = vpop.xlane.xlu0 %292  ;;  %v299_v17 = vpop.xlane.xlu1 %298 }
  0xca   : > { %v316_v18 = vmul.f32 0.03125, %v293_v16  ;;  %v318_v19 = vmul.f32 0.03125, %v299_v17  ;;  %v689_v16 = vld [vmem:[%s1277_s1] ss:$0 sm:$0xff] }
  0xcc   : > { %v1119_v20 = vsub.f32 %v282_v0, %v316_v18  ;;  %v1121_v21 = vsub.f32 %v284_v1, %v318_v19 }
  0xcd   : > { %v296_v22 = vpop.xlane.xlu0 %295  ;;  %v302_v23 = vpop.xlane.xlu1 %301 }
  0xce   : > { %v317_v24 = vmul.f32 0.03125, %v296_v22  ;;  %v319_v25 = vmul.f32 0.03125, %v302_v23  ;;  %v332_v26 = vmul.f32 %v1119_v20, %v1119_v20  ;;  %v334_v27 = vmul.f32 %v1121_v21, %v1121_v21  ;;  %v690_v22 = vld [vmem:[%s1278_s2] ss:$0 sm:$0xff] }
  0xd0   : > { %v1127_v28 = vsub.f32 %v283_v2, %v317_v24  ;;  %v1129_v29 = vsub.f32 %v285_v5, %v319_v25  ;;  %v340_v30 = vsel %vm290_vm0, %v332_v26, 0.0  ;;  %v346_v33 = vsel %vm290_vm0, %v334_v27, 0.0 }
  0xd1   : > { %341 = vadd.xlane.f32.xlu0 %v340_v30  ;;  %v305_v31 = vpop.xlane.xlu0 %304  ;;  %v308_v32 = vpop.xlane.xlu1 %307 }
  0xd2   : > { %v320_v34 = vmul.f32 0.03125, %v305_v31  ;;  %v321_v35 = vmul.f32 0.03125, %v308_v32  ;;  %v333_v36 = vmul.f32 %v1127_v28, %v1127_v28  ;;  %v335_v37 = vmul.f32 %v1129_v29, %v1129_v29 }
  0xd4   : > { %v1137_v38 = vsub.f32 %v286_v8, %v320_v34  ;;  %v1139_v39 = vsub.f32 %v287_v9, %v321_v35  ;;  %v343_v40 = vsel %vm290_vm0, %v333_v36, 0.0  ;;  %v349_v43 = vsel %vm290_vm0, %v335_v37, 0.0 }
  0xd5   : > { %347 = vadd.xlane.f32.xlu0 %v346_v33  ;;  %344 = vadd.xlane.f32.xlu1 %v343_v40  ;;  %v311_v41 = vpop.xlane.xlu0 %310  ;;  %v314_v42 = vpop.xlane.xlu1 %313 }
  0xd6   : > { %v322_v44 = vmul.f32 0.03125, %v311_v41  ;;  %v323_v45 = vmul.f32 0.03125, %v314_v42  ;;  %v336_v46 = vmul.f32 %v1137_v38, %v1137_v38  ;;  %v337_v47 = vmul.f32 %v1139_v39, %v1139_v39 }
  0xd8   : > { %v1147_v48 = vsub.f32 %v288_v12, %v322_v44  ;;  %v1149_v49 = vsub.f32 %v289_v13, %v323_v45  ;;  %v352_v50 = vsel %vm290_vm0, %v336_v46, 0.0  ;;  %v355_v51 = vsel %vm290_vm0, %v337_v47, 0.0 }
  0xd9   : > { %350 = vadd.xlane.f32.xlu1 %v349_v43  ;;  %353 = vadd.xlane.f32.xlu0 %v352_v50 }
  0xda   : > { %v338_v52 = vmul.f32 %v1147_v48, %v1147_v48  ;;  %v339_v53 = vmul.f32 %v1149_v49, %v1149_v49 }
  0xdc   : > { %v358_v54 = vsel %vm290_vm0, %v338_v52, 0.0  ;;  %v361_v55 = vsel %vm290_vm0, %v339_v53, 0.0 }
  0xdd   : > { %356 = vadd.xlane.f32.xlu1 %v355_v51  ;;  %359 = vadd.xlane.f32.xlu0 %v358_v54 }
  0xe1   : > { %362 = vadd.xlane.f32.xlu1 %v361_v55 }
 0x15e   : > { %v342_v58 = vpop.xlane.xlu0 %341 }
 0x15f   : > { %v364_v59 = vmul.f32 0.03125, %v342_v58  ;;  %v434_v58 = vld [vmem:[%s1279_s3] sm:$0xf] }
 0x161   : > { %v372_v60 = vadd.f32 1e-05, %v364_v59 }
 0x162   : > { %v345_v61 = vpop.xlane.xlu1 %344  ;;  %v348_v62 = vpop.xlane.xlu0 %347 }
 0x163   : > { %820 = vrsqrt.f32 %v372_v60  ;;  %v365_v63 = vmul.f32 0.03125, %v345_v61  ;;  %v366_v0 = vmul.f32 0.03125, %v348_v62 }
 0x165   : > { %v373_v1 = vadd.f32 1e-05, %v365_v63  ;;  %v374_v2 = vadd.f32 1e-05, %v366_v0 }
 0x166   : > { %v351_v3 = vpop.xlane.xlu1 %350  ;;  %v354_v4 = vpop.xlane.xlu0 %353 }
 0x167   : > { %822 = vrsqrt.f32 %v373_v1  ;;  %v367_v5 = vmul.f32 0.03125, %v351_v3  ;;  %v368_v6 = vmul.f32 0.03125, %v354_v4 }
 0x168   : > { %824 = vrsqrt.f32 %v374_v2 }
 0x169   : > { %v375_v7 = vadd.f32 1e-05, %v367_v5  ;;  %v376_v8 = vadd.f32 1e-05, %v368_v6 }
 0x16a   : > { %v357_v9 = vpop.xlane.xlu1 %356  ;;  %v360_v10 = vpop.xlane.xlu0 %359 }
 0x16b   : > { %826 = vrsqrt.f32 %v375_v7  ;;  %v369_v11 = vmul.f32 0.03125, %v357_v9  ;;  %v370_v12 = vmul.f32 0.03125, %v360_v10 }
 0x16c   : > { %828 = vrsqrt.f32 %v376_v8 }
 0x16d   : > { %v821_v13 = vpop.eup %820  ;;  %v377_v14 = vadd.f32 1e-05, %v369_v11  ;;  %v378_v15 = vadd.f32 1e-05, %v370_v12 }
 0x16e   : > { %v363_v17 = vpop.xlane.xlu1 %362  ;;  %v388_v18 = vmul.f32 %v821_v13, %v1119_v20 }
 0x16f   : > { %830 = vrsqrt.f32 %v377_v14  ;;  %v371_v19 = vmul.f32 0.03125, %v363_v17 }
 0x170   : > { %832 = vrsqrt.f32 %v378_v15  ;;  %v403_v23 = vmul.f32 %v689_v16, %v388_v18 }
 0x171   : > { %v823_v24 = vpop.eup %822  ;;  %v379_v25 = vadd.f32 1e-05, %v371_v19 }
 0x172   : > { %v825_v26 = vpop.eup %824  ;;  %v389_v27 = vmul.f32 %v823_v24, %v1127_v28  ;;  %v418_v30 = vadd.f32 %v690_v22, %v403_v23 }
 0x173   : > { %v390_v31 = vmul.f32 %v825_v26, %v1121_v21  ;;  %834 = vrsqrt.f32 %v379_v25 }
 0x174   : > { %v404_v32 = vmul.f32 %v689_v16, %v389_v27  ;;  %426 = vst.msk [vmem:[%s1171_s24] sm:$0xff] %vm290_vm0, %v418_v30 }
 0x175   : > { %v827_v20 = vpop.eup %826  ;;  %v405_v33 = vmul.f32 %v689_v16, %v390_v31 }
 0x176   : > { %v829_v34 = vpop.eup %828  ;;  %v391_v35 = vmul.f32 %v827_v20, %v1129_v29  ;;  %v419_v36 = vadd.f32 %v690_v22, %v404_v32 }
 0x177   : > { %v392_v28 = vmul.f32 %v829_v34, %v1137_v38  ;;  %v420_v37 = vadd.f32 %v690_v22, %v405_v33 }
 0x178   : > { %427 = vst.msk [vmem:[%s1171_s24 + $0x8] sm:$0xff] %vm290_vm0, %v419_v36  ;;  %v736_v40 = vpack.c.bf16 %v419_v36, %v418_v30  ;;  %v406_v41 = vmul.f32 %v689_v16, %v391_v35 }
 0x179   : > { %v831_v42 = vpop.eup %830  ;;  %428 = vst.msk [vmem:[%s1171_s24 + $0x10] sm:$0xff] %vm290_vm0, %v420_v37  ;;  %v407_v29 = vmul.f32 %v689_v16, %v392_v28 }
 0x17a   : > { %v833_v43 = vpop.eup %832  ;;  %v393_v38 = vmul.f32 %v831_v42, %v1139_v39  ;;  %738 = vmatpush3.bf16.xpose.msk.msra.mxu0 %vm1179_vm2, %v736_v40  ;;  %v421_v44 = vadd.f32 %v690_v22, %v406_v41 }
 0x17b   : > { %v394_v45 = vmul.f32 %v833_v43, %v1147_v48  ;;  %739 = vmatprep.subr.bf16.mxu0 %v953_v56  ;;  %v422_v46 = vadd.f32 %v690_v22, %v407_v29 }
 0x17c   : > { %429 = vst.msk [vmem:[%s1171_s24 + $0x18] sm:$0xff] %vm290_vm0, %v421_v44  ;;  %v408_v47 = vmul.f32 %v689_v16, %v393_v38  ;;  %v740_v54 = vpack.c.bf16 %v421_v44, %v420_v37 }
 0x17d   : > { %v835_v50 = vpop.eup %834  ;;  %430 = vst.msk [vmem:[%s1171_s24 + $0x20] sm:$0xff] %vm290_vm0, %v422_v46  ;;  %v409_v51 = vmul.f32 %v689_v16, %v394_v45 }
 0x17e   : > { %v395_v39 = vmul.f32 %v835_v50, %v1149_v49  ;;  %v423_v52 = vadd.f32 %v690_v22, %v408_v47 }
 0x17f   : > { %v424_v53 = vadd.f32 %v690_v22, %v409_v51 }
 0x180   : > { %431 = vst.msk [vmem:[%s1171_s24 + $0x28] sm:$0xff] %vm290_vm0, %v423_v52  ;;  %v410_v48 = vmul.f32 %v689_v16, %v395_v39  ;;  %v744_v49 = vpack.c.bf16 %v423_v52, %v422_v46 }
 0x181   : > { %432 = vst.msk [vmem:[%s1171_s24 + $0x30] sm:$0xff] %vm290_vm0, %v424_v53 }
 0x182   : > { %742 = vmatpush3.bf16.xpose.msk.msra.mxu0 %vm1179_vm2, %v740_v54  ;;  %v425_v55 = vadd.f32 %v690_v22, %v410_v48 }
 0x183   : > { %743 = vmatprep.subr.bf16.mxu0 %v953_v56 }
 0x184   : > { %433 = vst.msk [vmem:[%s1171_s24 + $0x38] sm:$0xff] %vm290_vm0, %v425_v55  ;;  %v748_v57 = vpack.c.bf16 %v425_v55, %v424_v53 }
 0x18a   : > { %746 = vmatpush3.bf16.xpose.msk.msra.mxu0 %vm1179_vm2, %v744_v49 }
 0x18b   : > { %747 = vmatprep.subr.bf16.mxu0 %v953_v56 }
 0x192   : > { %750 = vmatpush3.bf16.xpose.msk.msra.mxu0 %vm1179_vm2, %v748_v57 }
 0x199   : > { %733 = vmatmul.mubr.msk.f32.vlgmr.msra.gmra.mrb[0].mxu0 %vm290_vm0, %v434_v58 }
 0x19a   : > { %879 = shalt.err (!%p876_p5)
}
 0x19b   : > { %s880_s17 = scalar_lea.hbm %s1220_s28, 1024  ;;  %s884_s12 = scalar_lea.hbm %s1280_s4, 2048 }
 0x19c   : > { %p881_p4 = scmp.ne.s32.totalorder %s1220_s28, %s880_s17  ;;  %p885_p12 = scmp.lt.u32.totalorder %s1220_s28, %s1280_s4 }
 0x19d   : > { %p886_p1 = scmp.lt.u32.totalorder %s884_s12, %s880_s17  ;;  %p888_p8 = scmp.lt.u32.totalorder %s880_s17, %s1220_s28 }
 0x19e   : > { %p882_p7 = pnand %p881_p4, %p1291_p9 }
 0x19f   : > { %p887_p3 = por %p886_p1, %p885_p12 }
 0x1a0   : > { %p883_p10 = pneg %p882_p7 }
 0x1a1   : > { %p889_p11 = por %p888_p8, %p887_p3 }
 0x1a3   : > { %p890_p0 = pnand %p889_p11, %p883_p10 }
 0x1a5   : > { %893 = shalt.err (!%p890_p0)
}
 0x1a6   : > { %s957_s27 = smov 128   ;;  %s958_s11 = smov 8   ;;  %vm532_vm3 = vcmask 519168  }
 0x1a7   : > { %753 = dma.vmem_to_hbm [thread:$0]  (%p1291_p9), %s1222_s15, 1024, %s1220_s28, %s535_s10, %s957_s27, %s957_s27, %s958_s11  }
 0x1a8   : > { %p275_p6 = scmp.lt.s32.totalorder %s940_s21, 1 }
 0x1aa   : > { %s1302_s21 = smov (!%p275_p6, %s940_s21), 1 }
 0x1ab   : > { %s688_s30 = sshll.u32 %s1302_s21, 2 }
 0x1ac   : > { %s281_s17 = scalar_lea.vmem %s1281_s5, %s688_s30 }
 0x26c   : > { %v528_v56 = vpop.f32.mrb[0].mxu0 }
 0x26d   : > { %533 = vst.msk [vmem:[%s281_s17] sm:$0xf] %vm532_vm3, %v528_v56  ;;  %v734_v59 = vpop.f32.mrb[1].mxu0 }
 0x26e PF: > { %s575_s24 = sand.u32 1, %s928_s18   ;;  %p1292_p13 = scmp.ne.s32.totalorder %s1286_s8, 0 }
 0x26f   : > { %p1293_p2 = scmp.ge.s32.totalorder %s948_s23, 2  ;;  %s576_s6 = scalar_lea.sflag [#allocation4], %s575_s24 }
 0x271   : > { %p760_p5 = pnand %p1293_p2, %p1292_p13 }
 0x273   : > { %923 = dma.done.wait (!%p760_p5), %s576_s6, 1024  }
 0x274   : > { %925 = vsyncadd (!%p760_p5), %s576_s6, 4294966272  ;;  %s22_s23 = sadd.s32 1, %s948_s23   ;;  %s1294_s18 = smov %s932_s19 }
 0x275   : > { %p19_p9 = scmp.ge.s32.totalorder %s22_s23, 4   ;;  %s1295_s19 = smov %s936_s20 }
 0x276   : > { %s1296_s20 = smov %s1045_s7  ;;  %s1297_s21 = smov %s944_s22 }
 0x277   : > { %s1298_s22 = smov %s1300_s26  ;;  %21 = sbr.rel (!%p19_p9) target bundleno = 6 (0x6), region = 93 }
 0x27e   :  { %591 = vsyncpa [#allocation3], 1 }
 0x27f   :  { %593 = vsyncpa [#allocation3 + $0x1], 1 }
 0x280   :  { %594 = vsyncpa [#allocation4], 1 }
 0x281   :  { %596 = vsyncpa [#allocation4 + $0x1], 1 }

</bundles_post_ra>
